<compile_context>
chip_gen: v6e
topology: v6e:2x2x1
jax: 0.10.0
libtpu: 0.0.40
codegen_flags: <defaults>
</compile_context>

<pallas_src>
import functools

import jax
import jax.numpy as jnp
from jax import lax
from jax.experimental import pallas as pl
from jax.experimental.pallas import tpu as pltpu


def _round_up(x, m):
    return ((x + m - 1) // m) * m


def _deq_solve_kernel(x_ref, wt_ref, ut_ref, b_ref, o_ref, *,
                      max_iter, beta, tol, mm_dtype):
    """Full DEQ solve for one (C, tile_n) column tile.

    x_ref : (1, C, T)   activations for this tile (input injection source)
    wt_ref: (C, C)      W^T  (z weights, pre-transposed in the wrapper)
    ut_ref: (C, C)      U^T  (x-injection weights, pre-transposed)
    b_ref : (C, 1)      bias column, broadcast over lanes
    o_ref : (1, C, T)   output tile
    """
    x = x_ref[0].astype(jnp.float32)                      # (C, T)
    wt = wt_ref[...].astype(jnp.float32)                  # (C, C)
    ut = ut_ref[...].astype(jnp.float32)                  # (C, C)
    b = b_ref[...].astype(jnp.float32)                    # (C, 1)

    # Input injection is constant across solver iterations -> hoist out of the
    # loop.  One-off cost, so keep f32 operands / f32 accumulation.
    inj = jnp.dot(ut, x, preferred_element_type=jnp.float32) + b   # (C, T)

    # Inner-loop matmul: bf16 operands + f32 accumulation (full MXU rate on
    # v6e/v7x; the damped fixed-point iteration is self-correcting).
    wt_mm = wt.astype(mm_dtype)

    def f_fast(z):
        zw = jnp.dot(wt_mm, z.astype(mm_dtype),
                     preferred_element_type=jnp.float32)
        # TODO(synk): for small C the single EUP slot (tanh) binds before the
        # MXU; a VPU polynomial tanh would relieve it — kept exact here.
        return jnp.tanh(zw + inj)

    def f_exact(z):
        # Final application directly produces the module output -> keep f32
        # operands and f32 accumulation.
        return jnp.tanh(jnp.dot(wt, z, preferred_element_type=jnp.float32) + inj)

    # solver_fwd with x0 = zeros_like(x):
    # TODO(synk): Anderson mixing (deq_fwd_anderson_m) is replaced by a
    # beta-damped Picard iteration with the same tol / max_iter early exit;
    # for a contraction both converge to the same fixed point.
    z0 = jnp.zeros_like(inj)

    def cond_fn(carry):
        it, _, res = carry
        return jnp.logical_and(it < max_iter, res > tol)

    def body_fn(carry):
        it, z, _ = carry
        fz = f_fast(z)
        res = jnp.max(jnp.abs(fz - z))          # solver residual ||f(z) - z||_inf
        z_new = (1.0 - beta) * z + beta * fz
        return it + 1, z_new, res

    _, z, _ = lax.while_loop(
        cond_fn, body_fn, (jnp.int32(0), z0, jnp.float32(1e30)))

    # The module re-applies f once outside the no_grad solve: z = self.f(z, x).
    z = f_exact(z)
    o_ref[0] = z.astype(o_ref.dtype)


def deq_layer_forward(x_nchw, w, u, b, *, max_iter=30, beta=0.8, tol=1e-6,
                      tile_n=512, mm_dtype=jnp.bfloat16):
    """DEQLayer.forward equivalent (inference).  Returns (z, jac_loss=None)."""
    B, C, H, W = x_nchw.shape
    HW = H * W

    # Channels-first, lane-dense view: just a reshape, no transposes.
    x3 = x_nchw.reshape(B, C, HW)

    # Spatial (lane) tile: multiple of 128 lanes, as large as tile_n allows.
    T = min(int(tile_n), _round_up(HW, 128))
    T = max(128, (T // 128) * 128)
    HWp = _round_up(HW, T)
    if HWp != HW:
        # Padded columns solve an independent (zero-input) fixed point and are
        # sliced off afterwards; exactness is preserved.
        x3 = jnp.pad(x3, ((0, 0), (0, 0), (0, HWp - HW)))

    # Pre-transpose the (tiny) weights once so the kernel computes W^T @ Z.
    wt = jnp.transpose(w).astype(x3.dtype)        # (C, C)
    ut = jnp.transpose(u).astype(x3.dtype)        # (C, C)
    bc = jnp.reshape(b, (C, 1)).astype(x3.dtype)  # (C, 1)

    grid = (B, HWp // T)   # both axes independent -> both "parallel" (megacore)

    kernel = functools.partial(_deq_solve_kernel, max_iter=max_iter,
                               beta=beta, tol=tol, mm_dtype=mm_dtype)

    # Advisory cost: max_iter loop matmuls + injection + final application.
    flops = 2 * C * C * B * HWp * (max_iter + 2)
    transcendentals = C * B * HWp * (max_iter + 1)
    bytes_accessed = 2 * B * C * HWp * 4 + (2 * C * C + C) * 4
    cost = pl.CostEstimate(flops=int(flops),
                           transcendentals=int(transcendentals),
                           bytes_accessed=int(bytes_accessed))

    # Explicit VMEM budget: double-buffered x/out tiles, weights (grid-invariant
    # but still double-buffered by the pipeline), plus the in-loop f32 working
    # set.  Capped at 32 MiB so the same setting is valid on v5e/v6e/v7x.
    tile_bytes = C * T * 4
    weight_bytes = (2 * C * C + C) * 4
    vmem_est = 2 * 2 * tile_bytes + 2 * weight_bytes + 12 * tile_bytes
    vmem_limit = int(min(32 * 1024 * 1024, max(3 * vmem_est, 16 * 1024 * 1024)))

    z3 = pl.pallas_call(
        kernel,
        out_shape=jax.ShapeDtypeStruct((B, C, HWp), x_nchw.dtype),
        grid=grid,
        in_specs=[
            pl.BlockSpec((1, C, T), lambda bi, ti: (bi, 0, ti)),  # x tile
            pl.BlockSpec((C, C), lambda bi, ti: (0, 0)),          # W^T (grid-invariant)
            pl.BlockSpec((C, C), lambda bi, ti: (0, 0)),          # U^T (grid-invariant)
            pl.BlockSpec((C, 1), lambda bi, ti: (0, 0)),          # bias
        ],
        out_specs=pl.BlockSpec((1, C, T), lambda bi, ti: (bi, 0, ti)),
        compiler_params=pltpu.CompilerParams(
            dimension_semantics=("parallel", "parallel"),
            vmem_limit_bytes=vmem_limit),
        cost_estimate=cost,
    )(x3, wt, ut, bc)

    z = z3[:, :, :HW].reshape(B, C, H, W)   # drop lane padding; still NCHW

    jac_loss = None  # eval mode (self.training False) -> jac_loss is None
    # TODO(synk): backward_hook / solver_bwd (implicit-function gradient) and
    # jac_loss_estimate are training/backward-only; not part of this forward kernel.
    return z, jac_loss


def _reference(x_nchw, w, u, b, *, max_iter=30, beta=0.8, tol=1e-6):
    """Pure-JAX f32 (HIGHEST precision) reference of the same forward semantics."""
    B, C, H, W = x_nchw.shape
    hi = lax.Precision.HIGHEST
    x2 = x_nchw.reshape(B, C, H * W).astype(jnp.float32)
    wf = w.astype(jnp.float32)
    uf = u.astype(jnp.float32)
    bf = b.reshape(1, C, 1).astype(jnp.float32)

    inj = jnp.einsum("ij,bjn->bin", uf.T, x2, precision=hi) + bf

    def f(z):
        return jnp.tanh(jnp.einsum("ij,bjn->bin", wf.T, z, precision=hi) + inj)

    z = jnp.zeros_like(inj)

    def cond_fn(carry):
        it, _, res = carry
        return jnp.logical_and(it < max_iter, res > tol)

    def body_fn(carry):
        it, z, _ = carry
        fz = f(z)
        res = jnp.max(jnp.abs(fz - z))
        return it + 1, (1.0 - beta) * z + beta * fz, res

    _, z, _ = lax.while_loop(cond_fn, body_fn,
                             (jnp.int32(0), z, jnp.float32(1e30)))
    z = f(z)
    return z.reshape(B, C, H, W).astype(x_nchw.dtype)


if __name__ == "__main__":
    key = jax.random.PRNGKey(0)
    kx, kw, ku, kb = jax.random.split(key, 4)

    B, C, H, W = 2, 8, 16, 16
    x = jax.random.normal(kx, (B, C, H, W), dtype=jnp.float32)

    # Deterministic synthetic parameters for f(z, x) = tanh(z @ W + x @ U + b).
    # W is scaled small so f is a contraction in z (fixed point exists/converges).
    w = 0.25 * jax.random.normal(kw, (C, C), dtype=jnp.float32) / jnp.sqrt(C)
    u = jax.random.normal(ku, (C, C), dtype=jnp.float32) / jnp.sqrt(C)
    b = 0.1 * jax.random.normal(kb, (1, C), dtype=jnp.float32)

    z, jac_loss = deq_layer_forward(x, w, u, b)
    z = jax.block_until_ready(z)

    z_ref = _reference(x, w, u, b)
    assert z.shape == (B, C, H, W)
    assert jac_loss is None
    # Tolerance covers the bf16-operand (f32-accumulate) matmuls used inside
    # the fixed-point loop; the injection and final application stay f32.
    assert jnp.allclose(z, z_ref, atol=2e-3, rtol=2e-3), "mismatch vs JAX reference"

    print("KERNEL_OK")
</pallas_src>

<mosaic_0001>
module attributes {stable_mosaic.version = 11 : i64} {
  func.func @_deq_solve_kernel(%arg0: i32, %arg1: i32, %arg2: memref<1x8x256xf32, #tpu.memory_space<vmem>>, %arg3: memref<8x8xf32, #tpu.memory_space<vmem>>, %arg4: memref<8x8xf32, #tpu.memory_space<vmem>>, %arg5: memref<8x1xf32, #tpu.memory_space<vmem>>, %arg6: memref<1x8x256xf32, #tpu.memory_space<vmem>>) attributes {dimension_semantics = [#tpu.dimension_semantics<parallel>, #tpu.dimension_semantics<parallel>], iteration_bounds = array<i64: 2, 1>, scalar_prefetch = 0 : i64, scratch_operands = 0 : i64, tpu.core_type = #tpu.core_type<tc>, window_params = [{transform_indices = @transform_0, window_bounds = array<i64: 1, 8, 256>}, {pipeline_mode = #tpu.pipeline_mode<synchronous>, transform_indices = @transform_1, window_bounds = array<i64: 8, 8>}, {pipeline_mode = #tpu.pipeline_mode<synchronous>, transform_indices = @transform_2, window_bounds = array<i64: 8, 8>}, {pipeline_mode = #tpu.pipeline_mode<synchronous>, transform_indices = @transform_3, window_bounds = array<i64: 8, 1>}, {transform_indices = @transform_4, window_bounds = array<i64: 1, 8, 256>}]} {
    %c0 = arith.constant 0 : index
    %c0_0 = arith.constant 0 : index
    %c0_1 = arith.constant 0 : index
    %0 = vector.load %arg2[%c0, %c0_0, %c0_1] : memref<1x8x256xf32, #tpu.memory_space<vmem>>, vector<1x8x256xf32>
    %1 = vector.shape_cast %0 : vector<1x8x256xf32> to vector<8x256xf32>
    %c0_2 = arith.constant 0 : index
    %c0_3 = arith.constant 0 : index
    %2 = vector.load %arg3[%c0_2, %c0_3] : memref<8x8xf32, #tpu.memory_space<vmem>>, vector<8x8xf32>
    %c0_4 = arith.constant 0 : index
    %c0_5 = arith.constant 0 : index
    %3 = vector.load %arg4[%c0_4, %c0_5] : memref<8x8xf32, #tpu.memory_space<vmem>>, vector<8x8xf32>
    %c0_6 = arith.constant 0 : index
    %c0_7 = arith.constant 0 : index
    %4 = vector.load %arg5[%c0_6, %c0_7] : memref<8x1xf32, #tpu.memory_space<vmem>>, vector<8x1xf32>
    %cst = arith.constant dense<0.000000e+00> : vector<8x256xf32>
    %5 = tpu.matmul %3, %1, %cst {dimension_numbers = #tpu.dot_dimension_numbers<[1], [0], [0], [1], [0, 0, 1, 1], [], []>} : vector<8x8xf32>, vector<8x256xf32>, vector<8x256xf32> -> vector<8x256xf32>
    %6 = vector.broadcast %4 : vector<8x1xf32> to vector<8x256xf32>
    %7 = arith.addf %5, %6 : vector<8x256xf32>
    %8 = arith.truncf %2 : vector<8x8xf32> to vector<8x8xbf16>
    %cst_8 = arith.constant 0.000000e+00 : f32
    %9 = vector.broadcast %cst_8 : f32 to vector<8x256xf32>
    %c0_i32 = arith.constant 0 : i32
    %cst_9 = arith.constant 1.000000e+30 : f32
    %10:3 = scf.while (%arg7 = %c0_i32, %arg8 = %9, %arg9 = %cst_9) : (i32, vector<8x256xf32>, f32) -> (i32, vector<8x256xf32>, f32) {
      %c30_i32 = arith.constant 30 : i32
      %17 = arith.cmpi slt, %arg7, %c30_i32 : i32
      %cst_14 = arith.constant 9.99999997E-7 : f32
      %18 = arith.cmpf ogt, %arg9, %cst_14 : f32
      %19 = arith.andi %17, %18 : i1
      scf.condition(%19) %arg7, %arg8, %arg9 : i32, vector<8x256xf32>, f32
    } do {
    ^bb0(%arg7: i32, %arg8: vector<8x256xf32>, %arg9: f32):
      %17 = arith.truncf %arg8 : vector<8x256xf32> to vector<8x256xbf16>
      %cst_14 = arith.constant dense<0.000000e+00> : vector<8x256xf32>
      %18 = tpu.matmul %8, %17, %cst_14 {dimension_numbers = #tpu.dot_dimension_numbers<[1], [0], [0], [1], [0, 0, 1, 1], [], []>} : vector<8x8xbf16>, vector<8x256xbf16>, vector<8x256xf32> -> vector<8x256xf32>
      %19 = arith.addf %18, %7 : vector<8x256xf32>
      %20 = math.tanh %19 : vector<8x256xf32>
      %21 = arith.subf %20, %arg8 : vector<8x256xf32>
      %22 = math.absf %21 : vector<8x256xf32>
      %23 = vector.shape_cast %22 : vector<8x256xf32> to vector<1x8x256xf32>
      %cst_15 = arith.constant dense<0xFF800000> : vector<1xf32>
      %24 = vector.multi_reduction <maximumf>, %23, %cst_15 [1, 2] : vector<1x8x256xf32> to vector<1xf32>
      %25 = vector.shape_cast %24 : vector<1xf32> to vector<1x1x1xf32>
      %26 = vector.extract %25[0, 0, 0] : f32 from vector<1x1x1xf32>
      %cst_16 = arith.constant 2.000000e-01 : f32
      %27 = vector.broadcast %cst_16 : f32 to vector<8x256xf32>
      %28 = arith.mulf %27, %arg8 : vector<8x256xf32>
      %cst_17 = arith.constant 8.000000e-01 : f32
      %29 = vector.broadcast %cst_17 : f32 to vector<8x256xf32>
      %30 = arith.mulf %29, %20 : vector<8x256xf32>
      %31 = arith.addf %28, %30 : vector<8x256xf32>
      %c1_i32 = arith.constant 1 : i32
      %32 = arith.addi %arg7, %c1_i32 : i32
      scf.yield %32, %31, %26 : i32, vector<8x256xf32>, f32
    }
    %cst_10 = arith.constant dense<0.000000e+00> : vector<8x256xf32>
    %11 = tpu.matmul %2, %10#1, %cst_10 {dimension_numbers = #tpu.dot_dimension_numbers<[1], [0], [0], [1], [0, 0, 1, 1], [], []>} : vector<8x8xf32>, vector<8x256xf32>, vector<8x256xf32> -> vector<8x256xf32>
    %12 = arith.addf %11, %7 : vector<8x256xf32>
    %13 = math.tanh %12 : vector<8x256xf32>
    %c0_11 = arith.constant 0 : index
    %c0_12 = arith.constant 0 : index
    %c0_13 = arith.constant 0 : index
    %14 = vector.load %arg6[%c0_11, %c0_12, %c0_13] : memref<1x8x256xf32, #tpu.memory_space<vmem>>, vector<1x8x256xf32>
    %15 = vector.shape_cast %14 : vector<1x8x256xf32> to vector<8x256xf32>
    %16 = vector.shape_cast %13 : vector<8x256xf32> to vector<1x8x256xf32>
    tpu.vector_store %arg6[%c0_11, %c0_12, %c0_13], %16 {strides = array<i32>} : memref<1x8x256xf32, #tpu.memory_space<vmem>>, vector<1x8x256xf32>,
    return
  }
  func.func @transform_0(%arg0: i32, %arg1: i32) -> (i32, i32, i32) {
    %c0_i32 = arith.constant 0 : i32
    %c0_i32_0 = arith.constant 0 : i32
    return %arg0, %c0_i32, %arg1 : i32, i32, i32
  }
  func.func @transform_1(%arg0: i32, %arg1: i32) -> (i32, i32) {
    %c0_i32 = arith.constant 0 : i32
    %c0_i32_0 = arith.constant 0 : i32
    %c0_i32_1 = arith.constant 0 : i32
    return %c0_i32, %c0_i32_0 : i32, i32
  }
  func.func @transform_2(%arg0: i32, %arg1: i32) -> (i32, i32) {
    %c0_i32 = arith.constant 0 : i32
    %c0_i32_0 = arith.constant 0 : i32
    %c0_i32_1 = arith.constant 0 : i32
    return %c0_i32, %c0_i32_0 : i32, i32
  }
  func.func @transform_3(%arg0: i32, %arg1: i32) -> (i32, i32) {
    %c0_i32 = arith.constant 0 : i32
    %c0_i32_0 = arith.constant 0 : i32
    %c0_i32_1 = arith.constant 0 : i32
    return %c0_i32, %c0_i32_0 : i32, i32
  }
  func.func @transform_4(%arg0: i32, %arg1: i32) -> (i32, i32, i32) {
    %c0_i32 = arith.constant 0 : i32
    %c0_i32_0 = arith.constant 0 : i32
    return %arg0, %c0_i32, %arg1 : i32, i32, i32
  }
}

</mosaic_0001>

<bundles_post_ra>
// kernel: tpu_custom_call.1
= control target key start
LH: loop header
LB: loop body
LE: loop exit
PB: predicated region body
PF: predicated region fallthrough
CT: control target
= control target key end

     0   :  { %9 = vsyncpa [#allocation3], 0  ;;  %s1160_s0 = inlined_call_operand.hbm [shape: f32[2,8,256], index: 0, kind: input, shape index: {}]   ;;  %s1161_s1 = inlined_call_operand.vmem [shape: f32[8,8], index: 1, kind: input, shape index: {}]   ;;  %s1162_s2 = inlined_call_operand.hbm [shape: f32[8,8], index: 2, kind: input, shape index: {}]   ;;  %s1163_s3 = inlined_call_operand.vmem [shape: f32[8,1], index: 3, kind: input, shape index: {}]   ;;  %s1164_s4 = inlined_call_operand.hbm [shape: f32[2,8,256], index: 4, kind: output, shape index: {}]  }
   0x1   :  { %11 = vsyncpa [#allocation3 + $0x1], 0 }
   0x2   :  { %12 = vsyncpa [#allocation6], 0 }
   0x3   :  { %13 = vsyncpa [#allocation4], 0 }
   0x4   :  { %15 = vsyncpa [#allocation4 + $0x1], 0  ;;  %s953_s15 = smov 0   ;;  %s955_s16 = smov 0  }
   0x5   :  { %s957_s17 = smov 0   ;;  %s959_s18 = smov 0  }
   0x6   :  { %s961_s19 = smov 0   ;;  %s963_s20 = smov 0  }
   0x7 LB: > { %s624_s21 = sadd.s32 4294967295, %s908_s20   ;;  %s625_s22 = sadd.s32 4294967294, %s908_s20   ;;  %s908_s20 = sphi %s963_s20, %s21_s20   ;;  %s904_s19 = sphi %s961_s19, %s1181_s19   ;;  %s900_s18 = sphi %s959_s18, %s1180_s18   ;;  %s896_s17 = sphi %s957_s17, %s1179_s17   ;;  %s892_s16 = sphi %s955_s16, %s1178_s16   ;;  %s888_s15 = sphi %s953_s15, %s1177_s15  }
   0x8   : > { %p55_p0 = scmp.ne.s32.totalorder %s892_s16, %s888_s15  ;;  %p987_p1 = scmp.eq.s32.totalorder %s624_s21, 0 }
   0x9   : > { %p991_p2 = scmp.eq.s32.totalorder %s624_s21, 1  ;;  %p150_p3 = scmp.eq.s32.totalorder %s625_s22, 1 }
   0xa   : > { %p997_p4 = por %p987_p1, %p55_p0  ;;  %p626_p5 = scmp.ge.s32.totalorder %s908_s20, 1 }
   0xb   : > { %p1002_p6 = por %p150_p3, %p55_p0  ;;  %p157_p7 = scmp.lt.s32.totalorder %s908_s20, 3 }
   0xc   : > { %s1168_s25 = scalar_select %p997_p4, 1, 0 }
   0xd   : > { %s1169_s26 = scalar_select %p1002_p6, 1, 0 }
   0xe   : > { %p1007_p8 = pnand %p626_p5, %p157_p7  ;;  %s922_s28 = smov [#allocation5]  }
   0xf   : > { %s173_s29 = sshll.u32 %s922_s28, 4  ;;  %s33_s5 = sadd.s32 1, %s904_s19  ;;  %s174_s29 = int_to_ptr.vmem [resolvable:$true] %s173_s29 }
  0x10   : > { %p657_p10 = pneg %p1007_p8  ;;  %s42_s6 = sadd.s32 1, %s896_s17 }
  0x11   : > { %p35_p12 = scmp.ge.s32.totalorder %s33_s5, 2  ;;  %s769_s7 = scalar_lea.vmem %s174_s29, 128 }
  0x12   : > { %p1016_p11 = pnand %p657_p10, %p987_p1  ;;  %p770_p0 = scmp.ne.s32.totalorder %s174_s29, %s769_s7 }
  0x13   : > { %p777_p7 = scmp.lt.s32.totalorder %s174_s29, %s174_s29  ;;  %p778_p6 = scmp.lt.s32.totalorder %s769_s7, %s769_s7 }
  0x14   : > { %p760_p13 = pneg %p1016_p11 }
  0x15   : > { %p779_p9 = por %p778_p6, %p777_p7 }
  0x16   : > { %p772_p3 = pnand %p770_p0, %p760_p13 }
  0x18   : > { %p773_p5 = pneg %p772_p3 }
  0x1a   : > { %p780_p4 = pnand %p779_p9, %p773_p5 }
  0x1c   : > { %783 = shalt.err (!%p780_p4)
}
  0x1d   : > { %660 = dma.hbm_to_vmem [thread:$0]  (!%p1016_p11), %s1162_s2, 128, %s174_s29, [#allocation6]  }
  0x1e   : > { %s1183_s5 = smov (%p35_p12, %s33_s5), 0  ;;  %p49_p6 = scmp.ne.s32.totalorder %s896_s17, %s892_s16 }
  0x1f   : > { %p50_p4 = scmp.eq.s32.totalorder %s908_s20, 0  ;;  %s37_s10 = ssub.s32 %s904_s19, %s1183_s5 }
  0x20   : > { %p670_p9 = scmp.lt.s32.totalorder %s908_s20, 2  ;;  %p40_p10 = scmp.eq.s32.totalorder %s37_s10, 0 }
  0x21   : > { %p51_p13 = por %p50_p4, %p49_p6  ;;  %p1039_p0 = por %p991_p2, %p49_p6 }
  0x22   : > { %s187_s12 = sand.u32 1, %s896_s17   ;;  %s645_s21 = sshll.u32 %s904_s19, 8 }
  0x23   : > { %s1045_s13 = scalar_select %p40_p10, %s896_s17, %s42_s6  }
  0x24   : > { %s629_s14 = sshll.u32 %s187_s12, 4  ;;  %s199_s29 = scalar_lea.hbm %s1160_s0, %s645_s21 }
  0x25   : > { %s191_s30 = scalar_lea.vmem [#allocation2], %s629_s14  ;;  %p1051_p11 = pnand %p670_p9, %p51_p13 }
  0x26   : > { %s201_s7 = sshll.u32 %s191_s30, 4  ;;  %s188_s24 = scalar_lea.sflag [#allocation3], %s187_s12  ;;  %s202_s7 = int_to_ptr.vmem [resolvable:$true] %s201_s7 }
  0x27   : > { %p786_p2 = pneg %p1051_p11  ;;  %s797_s9 = scalar_lea.vmem %s202_s7, 256 }
  0x28   : > { %p798_p12 = scmp.ne.s32.totalorder %s202_s7, %s797_s9  ;;  %s923_s6 = smov [#allocation2]  }
  0x29   : > { %s802_s10 = sshll.u32 %s923_s6, 4  ;;  %s803_s10 = int_to_ptr.vmem [resolvable:$false] %s802_s10 }
  0x2a   : > { %p800_p3 = pnand %p798_p12, %p786_p2  ;;  %s804_s22 = scalar_lea.vmem %s803_s10, 512 }
  0x2b   : > { %p805_p7 = scmp.lt.s32.totalorder %s202_s7, %s803_s10  ;;  %p806_p6 = scmp.lt.s32.totalorder %s804_s22, %s797_s9 }
  0x2c   : > { %p801_p5 = pneg %p800_p3 }
  0x2d   : > { %p807_p4 = por %p806_p6, %p805_p7 }
  0x2f   : > { %p808_p10 = pnand %p807_p4, %p801_p5 }
  0x31   : > { %811 = shalt.err (!%p808_p10)
}
  0x32   : > { %664 = dma.hbm_to_vmem [thread:$0]  (!%p1051_p11), %s199_s29, 256, %s202_s7, %s188_s24  }
  0x33   : > { %210 = sbr.rel (%p1007_p8) target bundleno = 911 (0x38f), region = 36  ;;  %s1062_s12 = sand.u32 (!%p1007_p8), 1, %s892_s16  }
  0x34   : > { %s633_s14 = sshll.u32 (!%p1007_p8), %s1062_s12, 4  ;;  %s213_s21 = scalar_lea.sflag (!%p1007_p8), [#allocation3], %s1062_s12 }
  0x35   : > { %s216_s28 = scalar_lea.vmem (!%p1007_p8), [#allocation2], %s633_s14  ;;  %p1174_p9 = scmp.ne.s32.totalorder (!%p1007_p8), %s1168_s25, 0 }
  0x38   : > { %875 = dma.done.wait (%p1174_p9), %s213_s21, 256  }
  0x39   : > { %877 = vsyncadd (%p1174_p9), %s213_s21, 4294967040 }
  0x3a   : > { %879 = dma.done.wait (%p987_p1), [#allocation6], 128  }
  0x3b   : > { %881 = vsyncadd (%p987_p1), [#allocation6], 4294967168  ;;  %v924_v0 = vmov 0.0   ;;  %v925_v1 = vmov 0   ;;  %v1078_v2 = vld [vmem:[%s1161_s1] sm:$0xff]  ;;  %v249_v3 = vld [vmem:[%s216_s28 + $0x8] sm:$0xff] }
  0x3c   : > { %326 = vmatprep.mubr.f32.mxu0 %v924_v0  ;;  %749 = vset.pattern.permute.xlu0 %v925_v1  ;;  %v248_v4 = vld [vmem:[%s216_s28] sm:$0xff]  ;;  %vm258_vm0 = vcmask 64512   ;;  %v333_v5 = vpack.c.bf16 %v1078_v2, %v1078_v2  ;;  %s1090_s30 = scalar_lea.vmem [#allocation7], %s633_s14  ;;  %v910_v13 = vmov 0.0   ;;  %v914_v14 = vmov 0.0   ;;  %s1092_s7 = smov 0  }
  0x3d   : > { %292 = vmatprep.subr.mxu0 %v249_v3  ;;  %v251_v6 = vld [vmem:[#allocation5] sm:$0xff] }
  0x3e   : > { %v252_v7 = vld [vmem:[%s1163_s3] sm:$0xff]  ;;  %293 = vmatpush1.msra.mxu0 %v248_v4 }
  0x3f   : > { %255 = vperm.xlu0 %749, %v252_v7   ;;  %636 = vmatmul.mubr.msk.f32.vlgmr.msra.gmra.mxu0 %vm258_vm0, %v251_v6 }
  0xba   : > { %v256_v8 = vpop.permute.xlu0 %255 }
  0xff   : > { %v328_v9 = vpop.f32.mrf.mxu0 }
 0x100   : > { %v1086_v10 = vadd.f32 %v328_v9, %v256_v8 }
 0x101   : > { %v330_v11 = vpop.f32.mrf.mxu0 }
 0x102   : > { %v1088_v12 = vadd.f32 %v330_v11, %v256_v8 }
 0x103 LB: >> { %vm350_vm1 = vcmask 1043456   ;;  %v926_v15 = vmov 0   ;;  %v346_v16 = vpack.c.bf16 %v912_v13, %v912_v13  ;;  %v345_v17 = vpack.c.bf16 %v916_v14, %v916_v14  ;;  %s420_s7 = sadd.s32 1, %s920_s7   ;;  %s920_s7 = sphi %s1092_s7, %s420_s7   ;;  %v916_v14 = vphi %v914_v14, %v915_v14   ;;  %v912_v13 = vphi %v910_v13, %v911_v13  }
 0x104   : >> { %389 = vmatprep.mubr.bf16.mxu0 %v926_v15  ;;  %v414_v25 = vmul.f32 0.2, %v916_v14  ;;  %v415_v27 = vmul.f32 0.2, %v912_v13  ;;  %p339_p1 = scmp.lt.s32.totalorder %s420_s7, 30 }
 0x105   : >> { %637 = vmatprep.subr.msk.bf16.mxu0 %vm350_vm1, %v346_v16  ;;  %v352_v18 = vsel %vm350_vm1, %v345_v17, 0 }
 0x106   : >> { %372 = vmatpush1.bf16.msra.mxu0 %v352_v18 }
 0x109   : >> { %638 = vmatmul.mubr.msk.bf16.vlgmr.msra.gmra.mxu0 %vm258_vm0, %v333_v5 }
 0x1c9   : >> { %v391_v19 = vpop.f32.mrf.mxu0 }
 0x1ca   : >> { %v392_v20 = vadd.f32 %v391_v19, %v1086_v10 }
 0x1cb   : >> { %v393_v21 = vpop.f32.mrf.mxu0 }
 0x1cc   : >> { %750 = vtanh.f32 %v392_v20  ;;  %v394_v22 = vadd.f32 %v393_v21, %v1088_v12 }
 0x1cd   : >> { %v395_v23 = vpop.f32.mrf.mxu0 }
 0x1ce   : >> { %752 = vtanh.f32 %v394_v22 }
 0x1cf   : >> { %v396_v24 = vpop.f32.mrf.mxu0 }
 0x1d9   : >> { %v751_v26 = vpop.eup %750 }
 0x1da   : >> { %v416_v28 = vmul.f32 0.8, %v751_v26  ;;  %v400_v29 = vsub.f32 %v751_v26, %v916_v14 }
 0x1db   : >> { %v753_v30 = vpop.eup %752 }
 0x1dc   : >> { %v418_v31 = vadd.f32 %v416_v28, %v414_v25   ;;  %v417_v32 = vmul.f32 0.8, %v753_v30  ;;  %v401_v33 = vsub.f32 %v753_v30, %v912_v13  ;;  %v402_v35 = vand.u32 2147483647, %v400_v29 }
 0x1de   : >> { %v419_v34 = vadd.f32 %v417_v32, %v415_v27   ;;  %v403_v36 = vand.u32 2147483647, %v401_v33  ;;  %v915_v14 = vmov %v418_v31  }
 0x1e0   : >> { %v404_v37 = vmax.f32.f32 %v402_v35, %v403_v36  ;;  %v911_v13 = vmov %v419_v34  }
 0x1e2   : >> { %405 = vmax.xlane.f32.xlu0 %v404_v37 }
 0x26b   : >> { %v406_v38 = vpop.xlane.xlu0 %405 }
 0x26c   : >> { %v407_v39 = vrot.slane %v406_v38, 4 }
 0x26e   : >> { %v408_v40 = vmax.f32 %v406_v38, %v407_v39 }
 0x270   : >> { %v409_v41 = vrot.slane %v408_v40, 2 }
 0x272   : >> { %v410_v42 = vmax.f32 %v408_v40, %v409_v41 }
 0x274   : >> { %v411_v43 = vrot.slane %v410_v42, 1 }
 0x276   : >> { %v412_v44 = vmax.f32 %v410_v42, %v411_v43 }
 0x278   : >> { %647 = vpush %v412_v44 }
 0x2a9   : >> { %s648_s8 = spop %647 }
 0x2aa   : >> { %p340_p8 = scmp.gt.f32.partialorder %s648_s8, 1e-06 }
 0x2ac   : >> { %p341_p13 = pnand %p340_p8, %p339_p1 }
 0x2ad   : > { %454 = vmatprep.subr.mxu0 (%p341_p13), %v419_v34  ;;  %488 = vmatprep.mubr.f32.mxu0 (%p341_p13), %v924_v0  ;;  %s646_s24 = sshll.u32 (%p341_p13), %s900_s18, 8  ;;  %s516_s9 = sshll.u32 (%p341_p13), %s1090_s30, 4  ;;  %s517_s9 = int_to_ptr.vmem [resolvable:$true] %s516_s9 }
 0x2ae   : > { %344 = sbr.rel (!%p341_p13) target bundleno = 259 (0x103), region = 92  ;;  %455 = vmatpush1.msra.mxu0 (%p341_p13), %v418_v31  ;;  %s1117_s22 = scalar_lea.hbm (%p341_p13), %s1164_s4, %s646_s24 }
 0x2af   : > { %639 = vmatmul.mubr.msk.f32.vlgmr.msra.gmra.mxu0 (%p341_p13), %vm258_vm0, %v1078_v2  ;;  %s500_s14 = scalar_lea.sflag (%p341_p13), [#allocation4], %s1062_s12  ;;  %s812_s21 = scalar_lea.vmem (%p341_p13), %s517_s9, 256 }
 0x2b0   : > { %p813_p11 = scmp.ne.s32.totalorder (%p341_p13), %s517_s9, %s812_s21  ;;  %s927_s28 = smov (%p341_p13), [#allocation7]  }
 0x2b1   : > { %s816_s27 = sshll.u32 (%p341_p13), %s927_s28, 4  ;;  %s817_s27 = int_to_ptr.vmem [resolvable:$false] %s816_s27 }
 0x2b2   : > { %p814_p2 = pnand (%p341_p13), %p813_p11, %p1039_p0  ;;  %s818_s18 = scalar_lea.vmem (%p341_p13), %s817_s27, 512 }
 0x2b3   : > { %p819_p3 = scmp.lt.s32.totalorder %s517_s9, %s817_s27  ;;  %p820_p5 = scmp.lt.s32.totalorder %s818_s18, %s812_s21 }
 0x2b4   : > { %p815_p12 = pneg %p814_p2 }
 0x2b5   : > { %p821_p7 = por %p820_p5, %p819_p3 }
 0x2b7   : > { %p822_p6 = pnand %p821_p7, %p815_p12 }
 0x36f   : > { %v490_v45 = vpop.f32.mrf.mxu0 }
 0x370   : > { %v491_v46 = vadd.f32 %v490_v45, %v1086_v10 }
 0x371   : > { %v492_v47 = vpop.f32.mrf.mxu0 }
 0x372   : > { %754 = vtanh.f32 %v491_v46  ;;  %v493_v48 = vadd.f32 %v492_v47, %v1088_v12 }
 0x374   : > { %756 = vtanh.f32 %v493_v48 }
 0x37f   : > { %v755_v49 = vpop.eup %754 }
 0x380   : > { %497 = vst [vmem:[%s1090_s30] sm:$0xff] %v755_v49 }
 0x381   : > { %v757_v50 = vpop.eup %756 }
 0x382   : > { %498 = vst [vmem:[%s1090_s30 + $0x8] sm:$0xff] %v757_v50 }
 0x383   : > { %825 = shalt.err (!%p822_p6)
}
 0x384   : > { %s826_s29 = scalar_lea.hbm %s1117_s22, 256  ;;  %s830_s25 = scalar_lea.hbm %s1164_s4, 512 }
 0x385   : > { %p827_p4 = scmp.ne.s32.totalorder %s1117_s22, %s826_s29  ;;  %p831_p1 = scmp.lt.s32.totalorder %s1117_s22, %s1164_s4 }
 0x386   : > { %p832_p8 = scmp.lt.s32.totalorder %s830_s25, %s826_s29 }
 0x387   : > { %p828_p10 = pnand %p827_p4, %p1039_p0 }
 0x388   : > { %p833_p13 = por %p832_p8, %p831_p1 }
 0x389   : > { %p829_p9 = pneg %p828_p10 }
 0x38b   : > { %p834_p11 = pnand %p833_p13, %p829_p9 }
 0x38d   : > { %837 = shalt.err (!%p834_p11)
}
 0x38e   : > { %655 = dma.vmem_to_hbm [thread:$0]  (%p1039_p0), %s517_s9, 256, %s1117_s22, %s500_s14  }
 0x38f PF: > { %s528_s8 = sand.u32 1, %s888_s15   ;;  %p1175_p2 = scmp.ne.s32.totalorder %s1169_s26, 0 }
 0x390   : > { %p1176_p12 = scmp.ge.s32.totalorder %s908_s20, 2  ;;  %s529_s24 = scalar_lea.sflag [#allocation4], %s528_s8 }
 0x392   : > { %p666_p3 = pnand %p1176_p12, %p1175_p2 }
 0x394   : > { %p667_p5 = pneg %p666_p3 }
 0x396   : > { %883 = dma.done.wait (%p667_p5), %s529_s24, 256  }
 0x397   : > { %885 = vsyncadd (%p667_p5), %s529_s24, 4294967040  ;;  %s21_s20 = sadd.s32 1, %s908_s20   ;;  %s1177_s15 = smov %s892_s16 }
 0x398   : > { %p18_p7 = scmp.ge.s32.totalorder %s21_s20, 4   ;;  %s1178_s16 = smov %s896_s17 }
 0x399   : > { %s1179_s17 = smov %s1045_s13  ;;  %s1180_s18 = smov %s904_s19 }
 0x39a   : > { %s1181_s19 = smov %s1183_s5  ;;  %20 = sbr.rel (!%p18_p7) target bundleno = 7 (0x7), region = 103 }
 0x39f   :  { %534 = vsyncpa [#allocation3], 1 }
 0x3a0   :  { %536 = vsyncpa [#allocation3 + $0x1], 1 }
 0x3a1   :  { %537 = vsyncpa [#allocation6], 1 }
 0x3a2   :  { %538 = vsyncpa [#allocation4], 1 }
 0x3a3   :  { %540 = vsyncpa [#allocation4 + $0x1], 1 }

</bundles_post_ra>
